<compile_context>
chip_gen: v6e
topology: v6e:2x2x1
jax: 0.10.0
libtpu: 0.0.40
codegen_flags: <defaults>
</compile_context>

<pallas_src>
import jax
import jax.numpy as jnp
from jax.experimental import pallas as pl
from jax.experimental.pallas import tpu as pltpu


def _round_up(x, m):
    return ((x + m - 1) // m) * m


# ----------------------------------------------------------------------------
# Kernels
# ----------------------------------------------------------------------------
def _linear_resident_kernel(h_ref, w_ref, b_ref, o_ref):
    # h_ref: (tm, H) streamed   w_ref: (H, O) resident   b_ref: (1, O) resident
    # o_ref: (tm, O)
    acc = jnp.dot(h_ref[...], w_ref[...], preferred_element_type=jnp.float32)
    o_ref[...] = (acc + b_ref[...].astype(jnp.float32)).astype(o_ref.dtype)


def _linear_tiled_kernel(h_ref, w_ref, b_ref, o_ref, acc_ref):
    # Fallback for very large H*O: canonical tiled-accumulator matmul.
    # h_ref: (tm, TK)  w_ref: (TK, TN)  b_ref: (1, TN)  o_ref/acc_ref: (tm, TN)
    k = pl.program_id(2)

    @pl.when(k == 0)
    def _():
        acc_ref[...] = jnp.zeros_like(acc_ref)

    acc_ref[...] += jnp.dot(
        h_ref[...], w_ref[...], preferred_element_type=jnp.float32
    )

    @pl.when(k == pl.num_programs(2) - 1)
    def _():
        # Bias added once, at writeback (no per-tile broadcast into the acc).
        o_ref[...] = (acc_ref[...] + b_ref[...].astype(jnp.float32)).astype(
            o_ref.dtype
        )


# ----------------------------------------------------------------------------
# Wrappers
# ----------------------------------------------------------------------------
_TM_MAX = 1024                 # streaming row-tile target (HBM-roofline sweet spot)
_VMEM_TILE_BUDGET = 24 << 20   # per-plan estimate target; limit = 2x, capped 48 MiB


def _forward_resident(h2, w_t, b2, out_dtype):
    """M-only grid; W/bias VMEM-resident; h streamed in large row tiles."""
    M, H = h2.shape
    O = w_t.shape[1]
    in_item = jnp.dtype(h2.dtype).itemsize
    out_item = jnp.dtype(out_dtype).itemsize
    row_mult = 16 if in_item == 2 else 8

    Mp = _round_up(M, row_mult)
    if Mp <= _TM_MAX:
        tm = Mp                                    # degenerate single-block path
    else:
        tm = _TM_MAX

        def tile_bytes(t):
            return (2 * t * H * in_item            # double-buffered h tiles
                    + 2 * t * O * out_item         # double-buffered out tiles
                    + 2 * H * O * in_item          # resident W
                    + 2 * O * 4)                   # resident bias

        while tm > 8 * row_mult and tile_bytes(tm) > _VMEM_TILE_BUDGET:
            tm //= 2
        tm = max(_round_up(tm, row_mult), row_mult)
        Mp = _round_up(Mp, tm)

    h_p = h2 if Mp == M else jnp.pad(h2, ((0, Mp - M), (0, 0)))

    vmem_needed = (2 * tm * H * in_item + 2 * tm * O * out_item
                   + 2 * H * O * in_item + 2 * O * 4)
    vmem_limit = int(min(max(2 * vmem_needed, 8 << 20), 48 << 20))

    out_p = pl.pallas_call(
        _linear_resident_kernel,
        out_shape=jax.ShapeDtypeStruct((Mp, O), out_dtype),
        grid_spec=pltpu.PrefetchScalarGridSpec(
            num_scalar_prefetch=0,
            grid=(Mp // tm,),
            in_specs=[
                pl.BlockSpec((tm, H), lambda i: (i, 0)),   # streamed rows of h
                pl.BlockSpec((H, O), lambda i: (0, 0)),    # VMEM-resident W
                pl.BlockSpec((1, O), lambda i: (0, 0)),    # VMEM-resident bias
            ],
            out_specs=pl.BlockSpec((tm, O), lambda i: (i, 0)),
        ),
        compiler_params=pltpu.CompilerParams(
            dimension_semantics=("parallel",),
            vmem_limit_bytes=vmem_limit,
        ),
    )(h_p, w_t, b2)

    return out_p[:M, :]


def _forward_tiled(h2, w_t, b2, out_dtype):
    """Fallback for very large H*O (weights that cannot stay VMEM-resident)."""
    M, H = h2.shape
    O = w_t.shape[1]
    in_item = jnp.dtype(h2.dtype).itemsize
    out_item = jnp.dtype(out_dtype).itemsize
    row_mult = 16 if in_item == 2 else 8

    TK = 256 if H >= 256 else 128        # v6e/v7x MXU is 2x256x256
    TN = 256 if O >= 256 else 128
    tm = 256

    Mp = _round_up(_round_up(M, row_mult), tm)
    Kp = _round_up(H, TK)
    Np = _round_up(O, TN)

    h_p = h2 if (Mp == M and Kp == H) else jnp.pad(h2, ((0, Mp - M), (0, Kp - H)))
    w_p = w_t if (Kp == H and Np == O) else jnp.pad(w_t, ((0, Kp - H), (0, Np - O)))
    b_p = b2 if Np == O else jnp.pad(b2, ((0, 0), (0, Np - O)))

    vmem_needed = (2 * (tm * TK + TK * TN) * in_item
                   + 2 * TN * 4
                   + 2 * tm * TN * out_item
                   + tm * TN * 4)
    vmem_limit = int(min(max(2 * vmem_needed, 8 << 20), 48 << 20))

    out_p = pl.pallas_call(
        _linear_tiled_kernel,
        out_shape=jax.ShapeDtypeStruct((Mp, Np), out_dtype),
        grid_spec=pltpu.PrefetchScalarGridSpec(
            num_scalar_prefetch=0,
            grid=(Mp // tm, Np // TN, Kp // TK),
            in_specs=[
                pl.BlockSpec((tm, TK), lambda i, j, k: (i, k)),
                pl.BlockSpec((TK, TN), lambda i, j, k: (k, j)),
                pl.BlockSpec((1, TN), lambda i, j, k: (0, j)),
            ],
            out_specs=pl.BlockSpec((tm, TN), lambda i, j, k: (i, j)),
            scratch_shapes=[pltpu.VMEM((tm, TN), jnp.float32)],
        ),
        compiler_params=pltpu.CompilerParams(
            dimension_semantics=("parallel", "parallel", "arbitrary"),
            vmem_limit_bytes=vmem_limit,
        ),
    )(h_p, w_p, b_p)

    return out_p[:M, :O]


def dynamics_net_forward(h, w, b, *, compute_dtype=None):
    """y = h @ w.T + b, equivalent to torch.nn.Linear(hidden_dim, out_dim)(h).

    h: (..., H) float32  -- leading dims (batch, timesteps, ...) are flattened
    w: (O, H)   float32  -- PyTorch Linear weight layout
    b: (O,)     float32
    compute_dtype: optionally jnp.bfloat16 as an explicit perf mode for large
                   flattened M (halves h HBM traffic; accumulation stays f32).
    """
    lead_shape = h.shape[:-1]
    H = h.shape[-1]
    O, Hw = w.shape
    assert H == Hw, f"hidden dim mismatch: {H} vs {Hw}"
    out_dtype = h.dtype

    h2 = h.reshape(-1, H)
    if compute_dtype is not None:
        h2 = h2.astype(compute_dtype)
        w = w.astype(compute_dtype)

    # One-time weight prep (hoisted/constant-folded under jit with fixed params).
    w_t = jnp.transpose(w)                       # (H, O)
    b2 = b.reshape(1, O).astype(jnp.float32)     # (1, O)

    in_item = jnp.dtype(h2.dtype).itemsize
    if H * O * in_item <= (8 << 20):
        y = _forward_resident(h2, w_t, b2, out_dtype)
    else:
        y = _forward_tiled(h2, w_t, b2, out_dtype)

    return y.reshape(*lead_shape, O)


if __name__ == "__main__":
    # Small shapes consistent with DynamicsNet(hidden_dim, out_dim)
    batch, hidden_dim, out_dim = 8, 32, 16
    timesteps = 4  # dynamics models are typically rolled out over many steps

    key = jax.random.PRNGKey(0)
    k_h, k_hs, k_big, k_w, k_b = jax.random.split(key, 5)

    # Deterministic parameter init (PyTorch default: U(-1/sqrt(H), 1/sqrt(H)))
    bound = 1.0 / (hidden_dim ** 0.5)
    w = jax.random.uniform(k_w, (out_dim, hidden_dim), jnp.float32,
                           minval=-bound, maxval=bound)   # PyTorch (O, H)
    b = jax.random.uniform(k_b, (out_dim,), jnp.float32,
                           minval=-bound, maxval=bound)

    fwd = jax.jit(dynamics_net_forward)

    # Case 1: plain (B, H) forward, matches torch.nn.Linear(h)
    h = jax.random.normal(k_h, (batch, hidden_dim), jnp.float32)
    y = jax.block_until_ready(fwd(h, w, b))
    y_ref = h @ w.T + b
    assert y.shape == (batch, out_dim)
    assert jnp.allclose(y, y_ref, atol=1e-5, rtol=1e-5)

    # Case 2: batched rollout (T, B, H) — leading dims flattened into rows, so
    # one pallas_call streams all timesteps against the VMEM-resident weights.
    h_seq = jax.random.normal(k_hs, (timesteps, batch, hidden_dim), jnp.float32)
    y_seq = jax.block_until_ready(fwd(h_seq, w, b))
    y_seq_ref = h_seq @ w.T + b
    assert y_seq.shape == (timesteps, batch, out_dim)
    assert jnp.allclose(y_seq, y_seq_ref, atol=1e-5, rtol=1e-5)

    # Case 3: larger flattened M exercising the multi-block streaming grid
    # (unpadded K/N, resident weights, big row tiles).
    h_big = jax.random.normal(k_big, (2048, hidden_dim), jnp.float32)
    y_big = jax.block_until_ready(fwd(h_big, w, b))
    y_big_ref = h_big @ w.T + b
    assert y_big.shape == (2048, out_dim)
    assert jnp.allclose(y_big, y_big_ref, atol=1e-4, rtol=1e-4)

    print("KERNEL_OK")
</pallas_src>

<mosaic_0001>
module attributes {stable_mosaic.version = 11 : i64} {
  func.func @_linear_resident_kernel(%arg0: i32, %arg1: memref<8x32xf32, #tpu.memory_space<vmem>>, %arg2: memref<32x16xf32, #tpu.memory_space<vmem>>, %arg3: memref<1x16xf32, #tpu.memory_space<vmem>>, %arg4: memref<8x16xf32, #tpu.memory_space<vmem>>) attributes {dimension_semantics = [#tpu.dimension_semantics<parallel>], iteration_bounds = array<i64: 1>, scalar_prefetch = 0 : i64, scratch_operands = 0 : i64, tpu.core_type = #tpu.core_type<tc>, window_params = [{transform_indices = @transform_0, window_bounds = array<i64: 8, 32>}, {pipeline_mode = #tpu.pipeline_mode<synchronous>, transform_indices = @transform_1, window_bounds = array<i64: 32, 16>}, {pipeline_mode = #tpu.pipeline_mode<synchronous>, transform_indices = @transform_2, window_bounds = array<i64: 1, 16>}, {transform_indices = @transform_3, window_bounds = array<i64: 8, 16>}]} {
    %c0 = arith.constant 0 : index
    %c0_0 = arith.constant 0 : index
    %0 = vector.load %arg1[%c0, %c0_0] : memref<8x32xf32, #tpu.memory_space<vmem>>, vector<8x32xf32>
    %c0_1 = arith.constant 0 : index
    %c0_2 = arith.constant 0 : index
    %1 = vector.load %arg2[%c0_1, %c0_2] : memref<32x16xf32, #tpu.memory_space<vmem>>, vector<32x16xf32>
    %cst = arith.constant dense<0.000000e+00> : vector<8x16xf32>
    %2 = tpu.matmul %0, %1, %cst {dimension_numbers = #tpu.dot_dimension_numbers<[1], [0], [0], [1], [0, 0, 1, 1], [], []>} : vector<8x32xf32>, vector<32x16xf32>, vector<8x16xf32> -> vector<8x16xf32>
    %c0_3 = arith.constant 0 : index
    %c0_4 = arith.constant 0 : index
    %3 = vector.load %arg3[%c0_3, %c0_4] : memref<1x16xf32, #tpu.memory_space<vmem>>, vector<1x16xf32>
    %4 = vector.broadcast %3 : vector<1x16xf32> to vector<8x16xf32>
    %5 = arith.addf %2, %4 : vector<8x16xf32>
    %c0_5 = arith.constant 0 : index
    %c0_6 = arith.constant 0 : index
    %6 = vector.load %arg4[%c0_5, %c0_6] : memref<8x16xf32, #tpu.memory_space<vmem>>, vector<8x16xf32>
    tpu.vector_store %arg4[%c0_5, %c0_6], %5 {strides = array<i32>} : memref<8x16xf32, #tpu.memory_space<vmem>>, vector<8x16xf32>,
    return
  }
  func.func @transform_0(%arg0: i32) -> (i32, i32) {
    %c0_i32 = arith.constant 0 : i32
    %c0_i32_0 = arith.constant 0 : i32
    return %arg0, %c0_i32 : i32, i32
  }
  func.func @transform_1(%arg0: i32) -> (i32, i32) {
    %c0_i32 = arith.constant 0 : i32
    %c0_i32_0 = arith.constant 0 : i32
    %c0_i32_1 = arith.constant 0 : i32
    return %c0_i32, %c0_i32_0 : i32, i32
  }
  func.func @transform_2(%arg0: i32) -> (i32, i32) {
    %c0_i32 = arith.constant 0 : i32
    %c0_i32_0 = arith.constant 0 : i32
    %c0_i32_1 = arith.constant 0 : i32
    return %c0_i32, %c0_i32_0 : i32, i32
  }
  func.func @transform_3(%arg0: i32) -> (i32, i32) {
    %c0_i32 = arith.constant 0 : i32
    %c0_i32_0 = arith.constant 0 : i32
    return %arg0, %c0_i32 : i32, i32
  }
}

</mosaic_0001>

<bundles_post_ra>
// kernel: dynamics_net_forward.1
= control target key start
LH: loop header
LB: loop body
LE: loop exit
PB: predicated region body
PF: predicated region fallthrough
CT: control target
= control target key end

     0   :  { %v160_v1 = vmov 0.0   ;;  %vm161_vm0 = vmmov 0   ;;  %s204_s0 = inlined_call_operand.vmem [shape: f32[8,32], index: 0, kind: input, shape index: {}]   ;;  %s205_s1 = inlined_call_operand.vmem [shape: f32[32,16], index: 1, kind: input, shape index: {}]   ;;  %s206_s2 = inlined_call_operand.vmem [shape: f32[1,16], index: 2, kind: input, shape index: {}]   ;;  %s207_s3 = inlined_call_operand.hbm [shape: f32[8,16], index: 3, kind: output, shape index: {}]  }
   0x1   :  { %v19_v0 = vld [vmem:[%s205_s1 + $0x18] sm:$0xff]  ;;  %124 = vmatprep.subr.mxu0 %v160_v1  ;;  %v18_v2 = vld [vmem:[%s205_s1 + $0x10] sm:$0xff]  ;;  %132 = vmatprep.mubr.msk.f32.mxu0 %vm161_vm0, %v160_v1 }
   0x2   :  { %125 = vmatpush3.msra.mxu0 %v19_v0 }
   0x3   :  { %8 = vsyncpa [#allocation3], 0  ;;  %126 = vmatprep.subr.mxu0 %v160_v1  ;;  %v17_v3 = vld [vmem:[%s205_s1 + $0x8] sm:$0xff]  ;;  %v16_v4 = vld [vmem:[%s205_s1] sm:$0xff]  ;;  %vm27_vm1 = vcmask 261120   ;;  %s162_s24 = smov [#allocation2]  }
   0x4   :  { %127 = vmatpush3.msra.mxu0 %v18_v2  ;;  %v15_v5 = vld [vmem:[%s204_s0] sm:$0xff]  ;;  %s109_s25 = sshll.u32 %s162_s24, 4  ;;  %vm101_vm2 = vcmask 130048   ;;  %s110_s25 = int_to_ptr.vmem [resolvable:$true] %s109_s25 }
   0x5   :  { %128 = vmatprep.subr.mxu0 %v160_v1  ;;  %v117_v6 = vld [vmem:[%s206_s2] ss:$0 sm:$0xff]  ;;  %s138_s1 = scalar_lea.vmem %s110_s25, 128  ;;  %p143_p1 = scmp.lt.s32.totalorder %s110_s25, %s110_s25 }
   0x6   :  { %129 = vmatpush3.msra.mxu0 %v17_v3  ;;  %p139_p0 = scmp.ne.s32.totalorder %s110_s25, %s138_s1  ;;  %p144_p2 = scmp.lt.s32.totalorder %s138_s1, %s138_s1 }
   0x7   :  { %130 = vmatprep.subr.mxu0 %v160_v1 }
   0x8   :  { %131 = vmatpush3.msra.mxu0 %v16_v4  ;;  %p145_p3 = por %p144_p2, %p143_p1 }
   0x9   :  { %133 = vmatmul.mubr.msk.f32.vlgmr.msra.gmra.mxu0 %vm27_vm1, %v15_v5 }
   0xa   :  { %p146_p4 = pnand %p145_p3, %p139_p0 }
  0xc9   :  { %v97_v7 = vpop.f32.mrf.mxu0 }
  0xca   :  { %v98_v8 = vadd.f32 %v117_v6, %v97_v7 }
  0xcb   :  { %v134_v9 = vpop.f32.mrf.mxu0 }
  0xcc   :  { %102 = vst.msk [vmem:[#allocation2] sm:$0xff] %vm101_vm2, %v98_v8 }
  0xcd   :  { %149 = shalt.err (!%p146_p4)
}
  0xce   :  { %112 = dma.vmem_to_hbm [thread:$0]  %s110_s25, 128, %s207_s3, [#allocation3]  }
  0xcf   :  { %158 = dma.done.wait [#allocation3], 128  }
  0xd0   :  { %159 = vsyncadd [#allocation3], 4294967168 }
  0xd1   :  { %116 = vsyncpa [#allocation3], 1 }

</bundles_post_ra>
